<compile_context>
chip_gen: v7x
topology: tpu7x:2x2x1
jax: 0.10.0
libtpu: 0.0.40
codegen_flags: <defaults>
</compile_context>

<pallas_src>
import functools

import jax
import jax.numpy as jnp
from jax import lax
from jax.experimental import pallas as pl
from jax.experimental.pallas import tpu as pltpu


def _ls_ce_kernel(x_ref, tgt_ref, out_ref, *, smoothing, n_rows, block_rows,
                  chunk, n_chunks):
    """Per-block fused label-smoothing CE; emits one partial sum per block."""
    tm = block_rows
    c = chunk * n_chunks
    confidence = jnp.float32(1.0 - smoothing)
    uniform = jnp.float32(smoothing / c)

    tgt = tgt_ref[...]                                   # (TM, 1) int32

    # ---- pass 1: row max over class chunks (lane-axis reduce, XLU) ----------
    m = None
    for j in range(n_chunks):                            # static, chunk-sized views
        xc = x_ref[:, j * chunk:(j + 1) * chunk].astype(jnp.float32)
        mj = jnp.max(xc, axis=-1, keepdims=True)
        m = mj if m is None else jnp.maximum(m, mj)

    # ---- pass 2: accumulate sum(exp(p)), sum(p), p[target], p = x - m -------
    sumexp = jnp.zeros((tm, 1), jnp.float32)
    sum_p = jnp.zeros((tm, 1), jnp.float32)
    tgt_p = jnp.zeros((tm, 1), jnp.float32)
    for j in range(n_chunks):
        xc = x_ref[:, j * chunk:(j + 1) * chunk].astype(jnp.float32)
        p = xc - m
        sumexp = sumexp + jnp.sum(jnp.exp(p), axis=-1, keepdims=True)
        sum_p = sum_p + jnp.sum(p, axis=-1, keepdims=True)
        col = j * chunk + lax.broadcasted_iota(jnp.int32, p.shape, 1)
        tgt_p = tgt_p + jnp.sum(jnp.where(col == tgt, p, 0.0),
                                axis=-1, keepdims=True)

    # loss_row = lse - sum(w * x) with w = conf*onehot + smoothing/C, sum(w)=1
    #          = log(sum(exp(p))) - (uniform * sum(p) + conf * p[target])
    loss = jnp.log(sumexp) - (uniform * sum_p + confidence * tgt_p)   # (TM, 1)

    # Mask rows past the true batch (ragged last block, no wrapper pad).
    # NOTE: must stay a select (not mask*loss): OOB rows may hold NaN/Inf.
    row = pl.program_id(0) * block_rows + lax.broadcasted_iota(
        jnp.int32, (tm, 1), 0)
    loss = jnp.where(row < n_rows, loss, 0.0)

    out_ref[0, 0] = jnp.sum(loss)


def _round_up(x, m):
    return ((x + m - 1) // m) * m


def _device_budgets():
    """(target tile bytes, VMEM-limit cap) for the part we are tracing on."""
    try:
        cap = int(getattr(pltpu.get_tpu_info(), "vmem_capacity_bytes", 0))
    except Exception:
        cap = 0
    if cap and cap <= (64 << 20):        # v7x-class core: 64 MiB physical VMEM
        return 2 << 20, 40 << 20
    return 4 << 20, 64 << 20             # v5e / v6e: 128 MiB physical VMEM


def _pick_block_rows(n, c, itemsize, target_bytes):
    """Largest row block keeping the (rows, C) tile near target_bytes."""
    rows = max(16, target_bytes // max(1, c * itemsize))
    rows = max(16, (rows // 16) * 16)    # multiple of 16: valid for f32 & bf16
    rows = min(rows, _round_up(n, 16))
    return int(rows)


def _pick_chunk(c, max_chunk=1024, max_chunks=64):
    """Class-axis chunk size: divides C, multiple of 128, bounded unroll."""
    if c <= max_chunk or c % 128 != 0:
        return c
    for cand in range(max_chunk, 127, -128):
        if c % cand == 0 and pl.cdiv(c, cand) <= max_chunks:
            return cand
    return c                              # fall back to one full-width pass


def label_smoothing_cross_entropy(x, target, smoothing=0.5, *, block_rows=None):
    """x: (N, C) float logits (f32 or bf16); target: (N,) int class indices.

    Returns a float32 scalar:
        mean_n [ confidence * nll_n + smoothing * (-mean_c logprobs_nc) ].
    """
    N, C = x.shape
    itemsize = jnp.dtype(x.dtype).itemsize
    target_bytes, vmem_cap = _device_budgets()

    if block_rows is None:
        block_rows = _pick_block_rows(N, C, itemsize, target_bytes)
        # v7x has 2 TensorCores: make sure the "parallel" axis has >= 2 blocks.
        if pl.cdiv(N, block_rows) < 2 and N > 16:
            block_rows = max(16, _round_up(pl.cdiv(N, 2), 16))
    n_blocks = pl.cdiv(N, block_rows)

    chunk = _pick_chunk(C)
    n_chunks = C // chunk

    tgt2d = target.astype(jnp.int32).reshape(N, 1)

    kernel = functools.partial(
        _ls_ce_kernel,
        smoothing=float(smoothing),
        n_rows=N,
        block_rows=block_rows,
        chunk=chunk,
        n_chunks=n_chunks,
    )

    block_bytes = block_rows * C * itemsize
    # Double-buffered input tile + chunk-sized f32 intermediates, clamped to
    # the per-generation cap (raises v5e's 16 MiB scoped default, keeps v7x
    # well under its 64 MiB physical VMEM).
    vmem_limit = int(min(vmem_cap,
                         max(32 << 20,
                             2 * block_bytes
                             + 4 * block_rows * chunk * 4
                             + (2 << 20))))

    cost = pl.CostEstimate(
        flops=6 * N * C,
        transcendentals=N * C,
        bytes_accessed=N * C * itemsize + N * 4 + n_blocks * 4,
    )

    partials = pl.pallas_call(
        kernel,
        out_shape=jax.ShapeDtypeStruct((n_blocks, 1), jnp.float32),
        grid_spec=pltpu.PrefetchScalarGridSpec(
            num_scalar_prefetch=0,
            grid=(n_blocks,),
            in_specs=[
                pl.BlockSpec((block_rows, C), lambda i: (i, 0)),
                pl.BlockSpec((block_rows, 1), lambda i: (i, 0)),
            ],
            out_specs=pl.BlockSpec(
                (1, 1), lambda i: (i, 0), memory_space=pltpu.SMEM
            ),
        ),
        compiler_params=pltpu.CompilerParams(
            dimension_semantics=("parallel",),   # independent per-block partials
            vmem_limit_bytes=vmem_limit,
        ),
        cost_estimate=cost,
    )(x, tgt2d)

    return jnp.sum(partials) / jnp.float32(N)


def _reference(x, target, smoothing=0.5):
    confidence = 1.0 - smoothing
    logprobs = jax.nn.log_softmax(x.astype(jnp.float32), axis=-1)
    nll = -jnp.take_along_axis(
        logprobs, target[:, None].astype(jnp.int32), axis=-1
    )[:, 0]
    smooth = -jnp.mean(logprobs, axis=-1)
    return jnp.mean(confidence * nll + smoothing * smooth)


if __name__ == "__main__":
    key = jax.random.PRNGKey(0)
    kx, kt = jax.random.split(key)

    # Case 1: lane-aligned f32 logits, single block.
    N, C = 16, 128
    x = jax.random.normal(kx, (N, C), dtype=jnp.float32)
    target = jax.random.randint(kt, (N,), 0, C, dtype=jnp.int32)
    loss = jax.block_until_ready(
        label_smoothing_cross_entropy(x, target, smoothing=0.5))
    ref = jax.block_until_ready(_reference(x, target, smoothing=0.5))
    assert jnp.allclose(loss, ref, atol=1e-5, rtol=1e-5), (loss, ref)

    # Case 2: ragged batch + bf16 logits (no wrapper pad; >=2 blocks; row mask).
    kx2, kt2 = jax.random.split(kt)
    N2, C2 = 50, 384
    x2 = jax.random.normal(kx2, (N2, C2), dtype=jnp.float32).astype(jnp.bfloat16)
    t2 = jax.random.randint(kt2, (N2,), 0, C2, dtype=jnp.int32)
    loss2 = jax.block_until_ready(
        label_smoothing_cross_entropy(x2, t2, smoothing=0.5))
    ref2 = jax.block_until_ready(
        _reference(x2.astype(jnp.float32), t2, smoothing=0.5))
    assert jnp.allclose(loss2, ref2, atol=1e-4, rtol=1e-4), (loss2, ref2)

    # Case 3: non-128-multiple class count + ragged batch (lane padding path).
    kx3, kt3 = jax.random.split(kt2)
    N3, C3 = 24, 100
    x3 = jax.random.normal(kx3, (N3, C3), dtype=jnp.float32)
    t3 = jax.random.randint(kt3, (N3,), 0, C3, dtype=jnp.int32)
    loss3 = jax.block_until_ready(
        label_smoothing_cross_entropy(x3, t3, smoothing=0.3))
    ref3 = jax.block_until_ready(_reference(x3, t3, smoothing=0.3))
    assert jnp.allclose(loss3, ref3, atol=1e-5, rtol=1e-5), (loss3, ref3)

    print("KERNEL_OK")
</pallas_src>

<mosaic_0001>
module attributes {stable_mosaic.version = 11 : i64} {
  func.func @_ls_ce_kernel(%arg0: i32, %arg1: memref<16x128xf32, #tpu.memory_space<vmem>>, %arg2: memref<16x1xi32, #tpu.memory_space<vmem>>, %arg3: memref<1x1xf32, #tpu.memory_space<smem>>) attributes {dimension_semantics = [#tpu.dimension_semantics<parallel>], iteration_bounds = array<i64: 1>, scalar_prefetch = 0 : i64, scratch_operands = 0 : i64, tpu.core_type = #tpu.core_type<tc>, window_params = [{transform_indices = @transform_0, window_bounds = array<i64: 16, 128>}, {transform_indices = @transform_1, window_bounds = array<i64: 16, 1>}, {transform_indices = @transform_2, window_bounds = array<i64: 1, 1>}]} {
    %c0 = arith.constant 0 : index
    %c0_0 = arith.constant 0 : index
    %0 = vector.load %arg2[%c0, %c0_0] : memref<16x1xi32, #tpu.memory_space<vmem>>, vector<16x1xi32>
    %c0_1 = arith.constant 0 : index
    %c0_2 = arith.constant 0 : index
    %1 = vector.load %arg1[%c0_1, %c0_2] : memref<16x128xf32, #tpu.memory_space<vmem>>, vector<16x128xf32>
    %cst = arith.constant dense<0xFF800000> : vector<16xf32>
    %2 = vector.multi_reduction <maximumf>, %1, %cst [1] : vector<16x128xf32> to vector<16xf32>
    %3 = vector.shape_cast %2 : vector<16xf32> to vector<16x1xf32>
    %cst_3 = arith.constant 0.000000e+00 : f32
    %4 = vector.broadcast %cst_3 : f32 to vector<16x1xf32>
    %cst_4 = arith.constant 0.000000e+00 : f32
    %5 = vector.broadcast %cst_4 : f32 to vector<16x1xf32>
    %cst_5 = arith.constant 0.000000e+00 : f32
    %6 = vector.broadcast %cst_5 : f32 to vector<16x1xf32>
    %c0_6 = arith.constant 0 : index
    %c0_7 = arith.constant 0 : index
    %7 = vector.load %arg1[%c0_6, %c0_7] : memref<16x128xf32, #tpu.memory_space<vmem>>, vector<16x128xf32>
    %8 = vector.broadcast %3 : vector<16x1xf32> to vector<16x128xf32>
    %9 = arith.subf %7, %8 : vector<16x128xf32>
    %10 = math.exp %9 : vector<16x128xf32>
    %cst_8 = arith.constant dense<0.000000e+00> : vector<16xf32>
    %11 = vector.multi_reduction <add>, %10, %cst_8 [1] : vector<16x128xf32> to vector<16xf32>
    %12 = vector.shape_cast %11 : vector<16xf32> to vector<16x1xf32>
    %13 = arith.addf %4, %12 : vector<16x1xf32>
    %cst_9 = arith.constant dense<0.000000e+00> : vector<16xf32>
    %14 = vector.multi_reduction <add>, %9, %cst_9 [1] : vector<16x128xf32> to vector<16xf32>
    %15 = vector.shape_cast %14 : vector<16xf32> to vector<16x1xf32>
    %16 = arith.addf %5, %15 : vector<16x1xf32>
    %17 = tpu.iota {dimensions = array<i32: 1>} : vector<16x128xi32>
    %c0_i32 = arith.constant 0 : i32
    %18 = vector.broadcast %c0_i32 : i32 to vector<16x128xi32>
    %19 = arith.addi %18, %17 : vector<16x128xi32>
    %20 = vector.broadcast %0 : vector<16x1xi32> to vector<16x128xi32>
    %21 = arith.cmpi eq, %19, %20 : vector<16x128xi32>
    %cst_10 = arith.constant 0.000000e+00 : f32
    %22 = vector.broadcast %cst_10 : f32 to vector<16x128xf32>
    %23 = arith.select %21, %9, %22 : vector<16x128xi1>, vector<16x128xf32>
    %cst_11 = arith.constant dense<0.000000e+00> : vector<16xf32>
    %24 = vector.multi_reduction <add>, %23, %cst_11 [1] : vector<16x128xf32> to vector<16xf32>
    %25 = vector.shape_cast %24 : vector<16xf32> to vector<16x1xf32>
    %26 = arith.addf %6, %25 : vector<16x1xf32>
    %27 = math.log %13 : vector<16x1xf32>
    %cst_12 = arith.constant 3.906250e-03 : f32
    %28 = vector.broadcast %cst_12 : f32 to vector<16x1xf32>
    %29 = arith.mulf %28, %16 : vector<16x1xf32>
    %cst_13 = arith.constant 5.000000e-01 : f32
    %30 = vector.broadcast %cst_13 : f32 to vector<16x1xf32>
    %31 = arith.mulf %30, %26 : vector<16x1xf32>
    %32 = arith.addf %29, %31 : vector<16x1xf32>
    %33 = arith.subf %27, %32 : vector<16x1xf32>
    %c16_i32 = arith.constant 16 : i32
    %34 = arith.muli %arg0, %c16_i32 : i32
    %35 = tpu.iota {dimensions = array<i32: 0>} : vector<16x1xi32>
    %36 = vector.broadcast %34 : i32 to vector<16x1xi32>
    %37 = arith.addi %36, %35 : vector<16x1xi32>
    %c16_i32_14 = arith.constant 16 : i32
    %38 = vector.broadcast %c16_i32_14 : i32 to vector<16x1xi32>
    %39 = arith.cmpi slt, %37, %38 : vector<16x1xi32>
    %cst_15 = arith.constant 0.000000e+00 : f32
    %40 = vector.broadcast %cst_15 : f32 to vector<16x1xf32>
    %41 = arith.select %39, %33, %40 : vector<16x1xi1>, vector<16x1xf32>
    %42 = vector.shape_cast %41 : vector<16x1xf32> to vector<1x16x1xf32>
    %cst_16 = arith.constant dense<0.000000e+00> : vector<1xf32>
    %43 = vector.multi_reduction <add>, %42, %cst_16 [1, 2] : vector<1x16x1xf32> to vector<1xf32>
    %44 = vector.shape_cast %43 : vector<1xf32> to vector<1x1x1xf32>
    %45 = vector.extract %44[0, 0, 0] : f32 from vector<1x1x1xf32>
    %c0_17 = arith.constant 0 : index
    %c0_18 = arith.constant 0 : index
    %46 = memref.load %arg3[%c0_17, %c0_18] : memref<1x1xf32, #tpu.memory_space<smem>>
    memref.store %45, %arg3[%c0_17, %c0_18] : memref<1x1xf32, #tpu.memory_space<smem>>
    return
  }
  func.func @transform_0(%arg0: i32) -> (i32, i32) {
    %c0_i32 = arith.constant 0 : i32
    %c0_i32_0 = arith.constant 0 : i32
    return %arg0, %c0_i32 : i32, i32
  }
  func.func @transform_1(%arg0: i32) -> (i32, i32) {
    %c0_i32 = arith.constant 0 : i32
    %c0_i32_0 = arith.constant 0 : i32
    return %arg0, %c0_i32 : i32, i32
  }
  func.func @transform_2(%arg0: i32) -> (i32, i32) {
    %c0_i32 = arith.constant 0 : i32
    %c0_i32_0 = arith.constant 0 : i32
    return %arg0, %c0_i32 : i32, i32
  }
}

</mosaic_0001>

<bundles_post_ra>
// kernel: tpu_custom_call.1
= control target key start
LH: loop header
LB: loop body
LE: loop exit
PB: predicated region body
PF: predicated region fallthrough
CT: control target
= control target key end

     0   :  { %v133_v2 = vmov 0   ;;  %s174_s0 = inlined_call_operand.vmem [shape: f32[16,128], index: 0, kind: input, shape index: {}]   ;;  %s175_s1 = inlined_call_operand.vmem [shape: s32[16,1], index: 1, kind: input, shape index: {}]   ;;  %s176_s2 = inlined_call_operand.hbm [shape: f32[1,1], index: 2, kind: output, shape index: {}]  }
   0x1   :  { %v14_v0 = vld [vmem:[%s174_s0] sm:$0xff]  ;;  %111 = vset.pattern.permute.xlu1 %v133_v2 }
   0x2   :  { %v12_v1 = vld [vmem:[%s175_s1] sm:$0xff]  ;;  %16 = vmax.xlane.f32.xlu0 %v14_v0 }
   0x3   :  { %7 = vsyncpa [#allocation3], 0  ;;  %v15_v3 = vld [vmem:[%s174_s0 + $0x8] sm:$0xff]  ;;  %41 = vperm.xlu1 %111, %v12_v1   ;;  %112 = vset.pattern.permute.xlu0 %v133_v2  ;;  %v38_v12 = vlaneseq  ;;  %vm79_vm2 = vcmask 7168   ;;  %s121_s18 = scalar_lea.hbm %s176_s2, 16 }
   0x4   :  { %v13_v4 = vld [vmem:[%s175_s1 + $0x8] sm:$0xff]  ;;  %p122_p0 = scmp.ne.s32.totalorder %s176_s2, %s121_s18  ;;  %p125_p1 = scmp.lt.u32.totalorder %s121_s18, %s176_s2 }
   0x5   :  { %v39_v14 = vand.u32 127, %v38_v12 }
   0x6   :  { %18 = vmax.xlane.f32.xlu0 %v15_v3  ;;  %p127_p2 = pnand %p125_p1, %p122_p0 }
   0x7   :  { %44 = vperm.xlu1 %111, %v13_v4  }
  0x82   :  { %v42_v15 = vpop.permute.xlu1 %41 }
  0x83   :  { %vm46_vm0 = vcmp.eq.s32.totalorder %v39_v14, %v42_v15 }
  0x86   :  { %v45_v16 = vpop.permute.xlu1 %44 }
  0x87   :  { %vm47_vm1 = vcmp.eq.s32.totalorder %v39_v14, %v45_v16 }
  0x8f   :  { %v17_v5 = vpop.xlane.xlu0 %16 }
  0x90   :  { %v20_v6 = vsub.f32 %v14_v0, %v17_v5 }
  0x92   :  { %v22_v7 = vmul.f32 1.442695, %v20_v6  ;;  %v48_v17 = vsel %vm46_vm0, %v20_v6, 0.0 }
  0x93   :  { %v19_v8 = vpop.xlane.xlu0 %18 }
  0x94   :  { %113 = vpow2.f32 %v22_v7  ;;  %v21_v9 = vsub.f32 %v15_v3, %v19_v8 }
  0x96   :  { %v24_v10 = vmul.f32 1.442695, %v21_v9  ;;  %v49_v18 = vsel %vm47_vm1, %v21_v9, 0.0 }
  0x98   :  { %115 = vpow2.f32 %v24_v10 }
  0x9e   :  { %v114_v11 = vpop.eup %113 }
  0x9f   :  { %26 = vadd.xlane.f32.xlu0 %v114_v11 }
  0xa2   :  { %v116_v13 = vpop.eup %115 }
  0xa3   :  { %32 = vadd.xlane.f32.xlu0 %v20_v6  ;;  %28 = vadd.xlane.f32.xlu1 %v116_v13 }
  0xa7   :  { %34 = vadd.xlane.f32.xlu0 %v21_v9 }
  0xab   :  { %50 = vadd.xlane.f32.xlu0 %v48_v17 }
  0xaf   :  { %52 = vadd.xlane.f32.xlu0 %v49_v18 }
 0x12c   :  { %v27_v19 = vpop.xlane.xlu0 %26 }
 0x12d   :  { %117 = vlog2.f32 %v27_v19 }
 0x130   :  { %v33_v20 = vpop.xlane.xlu0 %32  ;;  %v29_v21 = vpop.xlane.xlu1 %28 }
 0x131   :  { %119 = vlog2.f32 %v29_v21  ;;  %v60_v24 = vmul.f32 0.00390625, %v33_v20 }
 0x134   :  { %v35_v22 = vpop.xlane.xlu0 %34 }
 0x135   :  { %v61_v32 = vmul.f32 0.00390625, %v35_v22 }
 0x137   :  { %v118_v26 = vpop.eup %117 }
 0x138   :  { %v51_v23 = vpop.xlane.xlu0 %50  ;;  %v57_v30 = vmul.f32 0.6931472, %v118_v26 }
 0x139   :  { %v62_v25 = vmul.f32 0.5, %v51_v23 }
 0x13b   :  { %v120_v27 = vpop.eup %119  ;;  %v64_v28 = vadd.f32 %v62_v25, %v60_v24 }
 0x13c   :  { %v53_v29 = vpop.xlane.xlu0 %52  ;;  %v59_v31 = vmul.f32 0.6931472, %v120_v27 }
 0x13d   :  { %v63_v33 = vmul.f32 0.5, %v53_v29  ;;  %v66_v35 = vsub.f32 %v57_v30, %v64_v28 }
 0x13f   :  { %v65_v34 = vadd.f32 %v63_v33, %v61_v32  ;;  %v80_v37 = vsel %vm79_vm2, %v66_v35, 0.0 }
 0x141   :  { %v67_v36 = vsub.f32 %v59_v31, %v65_v34 }
 0x143   :  { %v81_v38 = vsel %vm79_vm2, %v67_v36, 0.0 }
 0x144   :  { %v82_v39 = vadd.f32 %v81_v38, %v80_v37 }
 0x146   :  { %83 = vadd.xlane.f32.xlu0 %v82_v39 }
 0x1d3   :  { %v84_v40 = vpop.xlane.xlu0 %83 }
 0x1d4   :  { %v85_v41 = vrot.slane %v84_v40, 4 }
 0x1d6   :  { %v86_v42 = vadd.f32 %v85_v41, %v84_v40 }
 0x1d8   :  { %v87_v43 = vrot.slane %v86_v42, 2 }
 0x1da   :  { %v88_v44 = vadd.f32 %v87_v43, %v86_v42 }
 0x1dc   :  { %v89_v45 = vrot.slane %v88_v44, 1 }
 0x1de   :  { %v90_v46 = vadd.f32 %v89_v45, %v88_v44 }
 0x1e0   :  { %107 = vpush %v90_v46 }
 0x211   :  { %s108_s0 = spop %107 }
 0x212   :  { %93 = sst [smem:[#allocation2]] %s108_s0 }
 0x213   :  { %130 = shalt.err (!%p127_p2)
}
 0x214   :  { %s134_s23 = smov [#allocation2]  }
 0x215   :  { %101 = dma.smem_to_hbm %s134_s23, 16, %s176_s2, [#allocation3]  }
 0x216   :  { %131 = dma.done.wait [#allocation3], 16  }
 0x217   :  { %132 = vsyncadd [#allocation3], 4294967280 }
 0x218   :  { %105 = sfence }
 0x219   :  { %106 = vsyncpa [#allocation3], 1 }

</bundles_post_ra>
